<compile_context>
chip_gen: v5e
topology: v5e:2x2
jax: 0.10.0
libtpu: 0.0.40
codegen_flags: <defaults>
</compile_context>

<pallas_src>
import functools

import jax
import jax.numpy as jnp
from jax.experimental import pallas as pl
from jax.experimental.pallas import tpu as pltpu

_LN_EPS = 1e-5
_LANES = 128


def _round_up(x, m):
    return ((x + m - 1) // m) * m


def _layernorm_relu(h, gamma, beta):
    """LayerNorm over the last dim (biased var, eps=1e-5) + affine + ReLU."""
    mean = jnp.mean(h, axis=-1, keepdims=True)
    c = h - mean
    var = jnp.mean(c * c, axis=-1, keepdims=True)   # biased variance, one pass
    y = c * jax.lax.rsqrt(var + _LN_EPS)
    return jnp.maximum(y * gamma + beta, 0.0)


def _fused_projector_kernel(x_ref, w1_ref, w2_ref, pvec_ref, o_ref, *,
                            ndf, c_out, rows_per):
    # x_ref   : (TM, d_in)    streamed input rows (native dtype, cast here)
    # w1_ref  : (d_in, ndf)   linear_1 weight, (in, out) layout, VMEM-resident
    # w2_ref  : (ndf, c_out)  linear_2 weight, (in, out) layout, VMEM-resident
    # pvec_ref: (6, c_out)    packed per-feature params:
    #             row 0: b1 (cols :ndf)   row 3: b2
    #             row 1: g1 (cols :ndf)   row 4: g2
    #             row 2: be1 (cols :ndf)  row 5: be2
    # o_ref   : (TM // rows_per, 128) when rows_per > 1 (lane-dense packed),
    #           else (TM, c_out)
    x = x_ref[...].astype(jnp.float32)
    pv = pvec_ref[...]
    b1, g1, be1 = pv[0:1, :ndf], pv[1:2, :ndf], pv[2:3, :ndf]
    b2, g2, be2 = pv[3:4, :], pv[4:5, :], pv[5:6, :]

    # ---- MLP 1: Linear -> LayerNorm -> ReLU ----
    h = jnp.dot(x, w1_ref[...], preferred_element_type=jnp.float32) + b1
    h = _layernorm_relu(h, g1, be1)

    # ---- MLP 2: Linear -> LayerNorm -> ReLU ----
    h2 = jnp.dot(h, w2_ref[...], preferred_element_type=jnp.float32) + b2
    h2 = _layernorm_relu(h2, g2, be2)

    if rows_per > 1:
        # Lane-dense packing: rows_per consecutive rows -> one 128-lane row.
        # Built from ops with robust Mosaic lowering: a leading-dim split
        # reshape (no-op shape cast), static middle-dim indexing, and a
        # minor-axis concatenate.  Equivalent to h2.reshape(TM//rows_per, 128).
        tm = h2.shape[0]
        h3 = h2.reshape(tm // rows_per, rows_per, c_out)
        o_ref[...] = jnp.concatenate(
            [h3[:, r, :] for r in range(rows_per)], axis=-1)
    else:
        o_ref[...] = h2


def projectors_linear_p2_forward(x, params, *, block_m=512):
    """x: (..., input_nc) -> (..., 2*ndf) float32. One fused Pallas kernel."""
    w1, w2, pvec = params["w1"], params["w2"], params["pvec"]
    lead, d_in = x.shape[:-1], x.shape[-1]
    ndf, c_out = w1.shape[-1], w2.shape[-1]

    m = 1
    for s in lead:
        m *= s
    x2d = x.reshape(m, d_in)            # no astype here: cast happens in-kernel

    # Lane-dense packed output only when c_out evenly tiles a 128-lane row.
    pack_out = (c_out < _LANES) and (_LANES % c_out == 0)
    rows_per = _LANES // c_out if pack_out else 1

    # Row-block size: multiple of 8 (sublanes) and of rows_per, capped for VMEM.
    # 512 rows * 96 cols * 4B * 2 (double buffer) ~ 0.4 MiB -> fits every
    # generation's default scoped VMEM (16 MiB v5e / 32 MiB v6e,v7x).
    row_mult = max(8, rows_per)
    tm = min(block_m, _round_up(m, row_mult))
    tm = _round_up(tm, row_mult)
    m_pad = _round_up(m, tm)
    if pack_out and m_pad > tm:
        # Multi-step grid: packed output block's sublane dim must be 8-aligned.
        tm = _round_up(tm, 8 * rows_per)
        m_pad = _round_up(m, tm)
    if m_pad != m:
        x2d = jnp.pad(x2d, ((0, m_pad - m), (0, 0)))

    grid = (m_pad // tm,)

    if pack_out:
        out_shape = jax.ShapeDtypeStruct((m_pad // rows_per, _LANES), jnp.float32)
        out_spec = pl.BlockSpec((tm // rows_per, _LANES), lambda i: (i, 0))
    else:
        out_shape = jax.ShapeDtypeStruct((m_pad, c_out), jnp.float32)
        out_spec = pl.BlockSpec((tm, c_out), lambda i: (i, 0))

    kernel = functools.partial(_fused_projector_kernel,
                               ndf=ndf, c_out=c_out, rows_per=rows_per)

    out = pl.pallas_call(
        kernel,
        out_shape=out_shape,
        grid=grid,
        in_specs=[
            pl.BlockSpec((tm, d_in), lambda i: (i, 0)),   # streamed rows
            pl.BlockSpec(w1.shape, lambda i: (0, 0)),     # VMEM-resident weight
            pl.BlockSpec(w2.shape, lambda i: (0, 0)),     # VMEM-resident weight
            pl.BlockSpec(pvec.shape, lambda i: (0, 0)),   # VMEM-resident params
        ],
        out_specs=out_spec,
        compiler_params=pltpu.CompilerParams(
            dimension_semantics=("parallel",)),           # 2 TCs on v7x
    )(x2d, w1, w2, pvec)

    out = out.reshape(m_pad, c_out)[:m]   # free row-major un-packing + unpad
    return out.reshape(*lead, c_out)


# ----------------------------------------------------------------------------
# Parameter init (deterministic, PyTorch-default-style uniform bounds)
# ----------------------------------------------------------------------------
def init_params(key, input_nc=96, ndf=8):
    ks = jax.random.split(key, 4)
    c_out = 2 * ndf

    def uinit(k, shape, fan_in):
        bound = 1.0 / jnp.sqrt(float(fan_in))
        return jax.random.uniform(k, shape, jnp.float32, -bound, bound)

    # Weights stored (in, out); transpose PyTorch nn.Linear weights on load.
    w1 = uinit(ks[0], (input_nc, ndf), input_nc)
    b1 = uinit(ks[1], (ndf,), input_nc)
    w2 = uinit(ks[2], (ndf, c_out), ndf)
    b2 = uinit(ks[3], (c_out,), ndf)
    g1, be1 = jnp.ones((ndf,), jnp.float32), jnp.zeros((ndf,), jnp.float32)
    g2, be2 = jnp.ones((c_out,), jnp.float32), jnp.zeros((c_out,), jnp.float32)

    # Pack the six per-feature vectors into a single (6, c_out) slab so the
    # kernel sees one operand (one DMA) instead of six.
    pvec = jnp.zeros((6, c_out), jnp.float32)
    pvec = pvec.at[0, :ndf].set(b1)
    pvec = pvec.at[1, :ndf].set(g1)
    pvec = pvec.at[2, :ndf].set(be1)
    pvec = pvec.at[3, :].set(b2)
    pvec = pvec.at[4, :].set(g2)
    pvec = pvec.at[5, :].set(be2)
    return {"w1": w1, "w2": w2, "pvec": pvec}


if __name__ == "__main__":
    key = jax.random.PRNGKey(0)
    kx, kp = jax.random.split(key)

    input_nc, ndf = 96, 8
    # small input consistent with the module: (batch=2, seq=8, features=96)
    x = jax.random.normal(kx, (2, 8, input_nc), jnp.float32)
    params = init_params(kp, input_nc=input_nc, ndf=ndf)

    y = jax.block_until_ready(projectors_linear_p2_forward(x, params))

    assert y.shape == (2, 8, 2 * ndf), y.shape
    assert y.dtype == jnp.float32
    assert bool(jnp.all(jnp.isfinite(y)))
    assert bool(jnp.all(y >= 0.0))  # final ReLU

    # Plain-JAX reference (same math as nn.Linear + nn.LayerNorm + ReLU).
    def ref_forward(xr, p):
        def mlp(h, w, b, g, be):
            h = h @ w + b
            mu = h.mean(-1, keepdims=True)
            var = ((h - mu) ** 2).mean(-1, keepdims=True)
            h = (h - mu) * jax.lax.rsqrt(var + _LN_EPS) * g + be
            return jnp.maximum(h, 0.0)
        pv = p["pvec"]
        nd = p["w1"].shape[-1]
        h = mlp(xr, p["w1"], pv[0, :nd], pv[1, :nd], pv[2, :nd])
        return mlp(h, p["w2"], pv[3], pv[4], pv[5])

    y_ref = ref_forward(x, params)
    # Loose tolerance: XLA's default f32 matmul precision on TPU differs
    # slightly from the in-kernel MXU path; real bugs would be O(1) off.
    assert jnp.allclose(y, y_ref, atol=3e-2, rtol=3e-2), \
        float(jnp.max(jnp.abs(y - y_ref)))
    print("KERNEL_OK")
</pallas_src>

<mosaic_0001>
module attributes {stable_mosaic.version = 11 : i64} {
  func.func @_fused_projector_kernel(%arg0: i32, %arg1: memref<16x96xf32, #tpu.memory_space<vmem>>, %arg2: memref<96x8xf32, #tpu.memory_space<vmem>>, %arg3: memref<8x16xf32, #tpu.memory_space<vmem>>, %arg4: memref<6x16xf32, #tpu.memory_space<vmem>>, %arg5: memref<2x128xf32, #tpu.memory_space<vmem>>) attributes {dimension_semantics = [#tpu.dimension_semantics<parallel>], iteration_bounds = array<i64: 1>, scalar_prefetch = 0 : i64, scratch_operands = 0 : i64, tpu.core_type = #tpu.core_type<tc>, window_params = [{transform_indices = @transform_0, window_bounds = array<i64: 16, 96>}, {pipeline_mode = #tpu.pipeline_mode<synchronous>, transform_indices = @transform_1, window_bounds = array<i64: 96, 8>}, {pipeline_mode = #tpu.pipeline_mode<synchronous>, transform_indices = @transform_2, window_bounds = array<i64: 8, 16>}, {pipeline_mode = #tpu.pipeline_mode<synchronous>, transform_indices = @transform_3, window_bounds = array<i64: 6, 16>}, {transform_indices = @transform_4, window_bounds = array<i64: 2, 128>}]} {
    %c0 = arith.constant 0 : index
    %c0_0 = arith.constant 0 : index
    %0 = vector.load %arg1[%c0, %c0_0] : memref<16x96xf32, #tpu.memory_space<vmem>>, vector<16x96xf32>
    %c0_1 = arith.constant 0 : index
    %c0_2 = arith.constant 0 : index
    %1 = vector.load %arg4[%c0_1, %c0_2] : memref<6x16xf32, #tpu.memory_space<vmem>>, vector<6x16xf32>
    %2 = vector.extract_strided_slice %1 {offsets = [0, 0], sizes = [1, 8], strides = [1, 1]} : vector<6x16xf32> to vector<1x8xf32>
    %3 = vector.extract_strided_slice %1 {offsets = [1, 0], sizes = [1, 8], strides = [1, 1]} : vector<6x16xf32> to vector<1x8xf32>
    %4 = vector.extract_strided_slice %1 {offsets = [2, 0], sizes = [1, 8], strides = [1, 1]} : vector<6x16xf32> to vector<1x8xf32>
    %5 = vector.extract_strided_slice %1 {offsets = [3, 0], sizes = [1, 16], strides = [1, 1]} : vector<6x16xf32> to vector<1x16xf32>
    %6 = vector.extract_strided_slice %1 {offsets = [4, 0], sizes = [1, 16], strides = [1, 1]} : vector<6x16xf32> to vector<1x16xf32>
    %7 = vector.extract_strided_slice %1 {offsets = [5, 0], sizes = [1, 16], strides = [1, 1]} : vector<6x16xf32> to vector<1x16xf32>
    %c0_3 = arith.constant 0 : index
    %c0_4 = arith.constant 0 : index
    %8 = vector.load %arg2[%c0_3, %c0_4] : memref<96x8xf32, #tpu.memory_space<vmem>>, vector<96x8xf32>
    %cst = arith.constant dense<0.000000e+00> : vector<16x8xf32>
    %9 = tpu.matmul %0, %8, %cst {dimension_numbers = #tpu.dot_dimension_numbers<[1], [0], [0], [1], [0, 0, 1, 1], [], []>} : vector<16x96xf32>, vector<96x8xf32>, vector<16x8xf32> -> vector<16x8xf32>
    %10 = vector.broadcast %2 : vector<1x8xf32> to vector<16x8xf32>
    %11 = arith.addf %9, %10 : vector<16x8xf32>
    %cst_5 = arith.constant dense<0.000000e+00> : vector<16xf32>
    %12 = vector.multi_reduction <add>, %11, %cst_5 [1] : vector<16x8xf32> to vector<16xf32>
    %13 = vector.shape_cast %12 : vector<16xf32> to vector<16x1xf32>
    %cst_6 = arith.constant 8.000000e+00 : f32
    %14 = vector.broadcast %cst_6 : f32 to vector<16x1xf32>
    %15 = arith.divf %13, %14 : vector<16x1xf32>
    %16 = vector.broadcast %15 : vector<16x1xf32> to vector<16x8xf32>
    %17 = arith.subf %11, %16 : vector<16x8xf32>
    %18 = arith.mulf %17, %17 : vector<16x8xf32>
    %cst_7 = arith.constant dense<0.000000e+00> : vector<16xf32>
    %19 = vector.multi_reduction <add>, %18, %cst_7 [1] : vector<16x8xf32> to vector<16xf32>
    %20 = vector.shape_cast %19 : vector<16xf32> to vector<16x1xf32>
    %cst_8 = arith.constant 8.000000e+00 : f32
    %21 = vector.broadcast %cst_8 : f32 to vector<16x1xf32>
    %22 = arith.divf %20, %21 : vector<16x1xf32>
    %cst_9 = arith.constant 9.99999974E-6 : f32
    %23 = vector.broadcast %cst_9 : f32 to vector<16x1xf32>
    %24 = arith.addf %22, %23 : vector<16x1xf32>
    %25 = math.rsqrt %24 : vector<16x1xf32>
    %26 = vector.broadcast %25 : vector<16x1xf32> to vector<16x8xf32>
    %27 = arith.mulf %17, %26 : vector<16x8xf32>
    %28 = vector.broadcast %3 : vector<1x8xf32> to vector<16x8xf32>
    %29 = arith.mulf %27, %28 : vector<16x8xf32>
    %30 = vector.broadcast %4 : vector<1x8xf32> to vector<16x8xf32>
    %31 = arith.addf %29, %30 : vector<16x8xf32>
    %cst_10 = arith.constant 0.000000e+00 : f32
    %32 = vector.broadcast %cst_10 : f32 to vector<16x8xf32>
    %33 = arith.maximumf %31, %32 : vector<16x8xf32>
    %c0_11 = arith.constant 0 : index
    %c0_12 = arith.constant 0 : index
    %34 = vector.load %arg3[%c0_11, %c0_12] : memref<8x16xf32, #tpu.memory_space<vmem>>, vector<8x16xf32>
    %cst_13 = arith.constant dense<0.000000e+00> : vector<16x16xf32>
    %35 = tpu.matmul %33, %34, %cst_13 {dimension_numbers = #tpu.dot_dimension_numbers<[1], [0], [0], [1], [0, 0, 1, 1], [], []>} : vector<16x8xf32>, vector<8x16xf32>, vector<16x16xf32> -> vector<16x16xf32>
    %36 = vector.broadcast %5 : vector<1x16xf32> to vector<16x16xf32>
    %37 = arith.addf %35, %36 : vector<16x16xf32>
    %cst_14 = arith.constant dense<0.000000e+00> : vector<16xf32>
    %38 = vector.multi_reduction <add>, %37, %cst_14 [1] : vector<16x16xf32> to vector<16xf32>
    %39 = vector.shape_cast %38 : vector<16xf32> to vector<16x1xf32>
    %cst_15 = arith.constant 1.600000e+01 : f32
    %40 = vector.broadcast %cst_15 : f32 to vector<16x1xf32>
    %41 = arith.divf %39, %40 : vector<16x1xf32>
    %42 = vector.broadcast %41 : vector<16x1xf32> to vector<16x16xf32>
    %43 = arith.subf %37, %42 : vector<16x16xf32>
    %44 = arith.mulf %43, %43 : vector<16x16xf32>
    %cst_16 = arith.constant dense<0.000000e+00> : vector<16xf32>
    %45 = vector.multi_reduction <add>, %44, %cst_16 [1] : vector<16x16xf32> to vector<16xf32>
    %46 = vector.shape_cast %45 : vector<16xf32> to vector<16x1xf32>
    %cst_17 = arith.constant 1.600000e+01 : f32
    %47 = vector.broadcast %cst_17 : f32 to vector<16x1xf32>
    %48 = arith.divf %46, %47 : vector<16x1xf32>
    %cst_18 = arith.constant 9.99999974E-6 : f32
    %49 = vector.broadcast %cst_18 : f32 to vector<16x1xf32>
    %50 = arith.addf %48, %49 : vector<16x1xf32>
    %51 = math.rsqrt %50 : vector<16x1xf32>
    %52 = vector.broadcast %51 : vector<16x1xf32> to vector<16x16xf32>
    %53 = arith.mulf %43, %52 : vector<16x16xf32>
    %54 = vector.broadcast %6 : vector<1x16xf32> to vector<16x16xf32>
    %55 = arith.mulf %53, %54 : vector<16x16xf32>
    %56 = vector.broadcast %7 : vector<1x16xf32> to vector<16x16xf32>
    %57 = arith.addf %55, %56 : vector<16x16xf32>
    %cst_19 = arith.constant 0.000000e+00 : f32
    %58 = vector.broadcast %cst_19 : f32 to vector<16x16xf32>
    %59 = arith.maximumf %57, %58 : vector<16x16xf32>
    %60 = vector.shape_cast %59 : vector<16x16xf32> to vector<2x8x16xf32>
    %61 = vector.extract_strided_slice %60 {offsets = [0, 0, 0], sizes = [2, 1, 16], strides = [1, 1, 1]} : vector<2x8x16xf32> to vector<2x1x16xf32>
    %62 = vector.shape_cast %61 : vector<2x1x16xf32> to vector<2x16xf32>
    %63 = vector.extract_strided_slice %60 {offsets = [0, 1, 0], sizes = [2, 1, 16], strides = [1, 1, 1]} : vector<2x8x16xf32> to vector<2x1x16xf32>
    %64 = vector.shape_cast %63 : vector<2x1x16xf32> to vector<2x16xf32>
    %65 = vector.extract_strided_slice %60 {offsets = [0, 2, 0], sizes = [2, 1, 16], strides = [1, 1, 1]} : vector<2x8x16xf32> to vector<2x1x16xf32>
    %66 = vector.shape_cast %65 : vector<2x1x16xf32> to vector<2x16xf32>
    %67 = vector.extract_strided_slice %60 {offsets = [0, 3, 0], sizes = [2, 1, 16], strides = [1, 1, 1]} : vector<2x8x16xf32> to vector<2x1x16xf32>
    %68 = vector.shape_cast %67 : vector<2x1x16xf32> to vector<2x16xf32>
    %69 = vector.extract_strided_slice %60 {offsets = [0, 4, 0], sizes = [2, 1, 16], strides = [1, 1, 1]} : vector<2x8x16xf32> to vector<2x1x16xf32>
    %70 = vector.shape_cast %69 : vector<2x1x16xf32> to vector<2x16xf32>
    %71 = vector.extract_strided_slice %60 {offsets = [0, 5, 0], sizes = [2, 1, 16], strides = [1, 1, 1]} : vector<2x8x16xf32> to vector<2x1x16xf32>
    %72 = vector.shape_cast %71 : vector<2x1x16xf32> to vector<2x16xf32>
    %73 = vector.extract_strided_slice %60 {offsets = [0, 6, 0], sizes = [2, 1, 16], strides = [1, 1, 1]} : vector<2x8x16xf32> to vector<2x1x16xf32>
    %74 = vector.shape_cast %73 : vector<2x1x16xf32> to vector<2x16xf32>
    %75 = vector.extract_strided_slice %60 {offsets = [0, 7, 0], sizes = [2, 1, 16], strides = [1, 1, 1]} : vector<2x8x16xf32> to vector<2x1x16xf32>
    %76 = vector.shape_cast %75 : vector<2x1x16xf32> to vector<2x16xf32>
    %77 = tpu.concatenate %62, %64, %66, %68, %70, %72, %74, %76 in 1 : vector<2x16xf32>, vector<2x16xf32>, vector<2x16xf32>, vector<2x16xf32>, vector<2x16xf32>, vector<2x16xf32>, vector<2x16xf32>, vector<2x16xf32> -> vector<2x128xf32>
    %c0_20 = arith.constant 0 : index
    %c0_21 = arith.constant 0 : index
    %78 = vector.load %arg5[%c0_20, %c0_21] : memref<2x128xf32, #tpu.memory_space<vmem>>, vector<2x128xf32>
    tpu.vector_store %arg5[%c0_20, %c0_21], %77 {strides = array<i32>} : memref<2x128xf32, #tpu.memory_space<vmem>>, vector<2x128xf32>,
    return
  }
  func.func @transform_0(%arg0: i32) -> (i32, i32) {
    %c0_i32 = arith.constant 0 : i32
    %c0_i32_0 = arith.constant 0 : i32
    return %arg0, %c0_i32 : i32, i32
  }
  func.func @transform_1(%arg0: i32) -> (i32, i32) {
    %c0_i32 = arith.constant 0 : i32
    %c0_i32_0 = arith.constant 0 : i32
    %c0_i32_1 = arith.constant 0 : i32
    return %c0_i32, %c0_i32_0 : i32, i32
  }
  func.func @transform_2(%arg0: i32) -> (i32, i32) {
    %c0_i32 = arith.constant 0 : i32
    %c0_i32_0 = arith.constant 0 : i32
    %c0_i32_1 = arith.constant 0 : i32
    return %c0_i32, %c0_i32_0 : i32, i32
  }
  func.func @transform_3(%arg0: i32) -> (i32, i32) {
    %c0_i32 = arith.constant 0 : i32
    %c0_i32_0 = arith.constant 0 : i32
    %c0_i32_1 = arith.constant 0 : i32
    return %c0_i32, %c0_i32_0 : i32, i32
  }
  func.func @transform_4(%arg0: i32) -> (i32, i32) {
    %c0_i32 = arith.constant 0 : i32
    %c0_i32_0 = arith.constant 0 : i32
    return %arg0, %c0_i32 : i32, i32
  }
}

</mosaic_0001>

<bundles_post_ra>
// kernel: tpu_custom_call.1
= control target key start
LH: loop header
LB: loop body
LE: loop exit
PB: predicated region body
PF: predicated region fallthrough
CT: control target
= control target key end

     0   :  { %s471_s0 = inlined_call_operand.vmem [shape: f32[16,96], index: 0, kind: input, shape index: {}]   ;;  %s472_s1 = inlined_call_operand.vmem [shape: f32[96,8], index: 1, kind: input, shape index: {}]   ;;  %s473_s2 = inlined_call_operand.vmem [shape: f32[8,16], index: 2, kind: input, shape index: {}]   ;;  %s474_s3 = inlined_call_operand.vmem [shape: f32[6,16], index: 3, kind: input, shape index: {}]   ;;  %s475_s4 = inlined_call_operand.hbm [shape: f32[2,128], index: 4, kind: output, shape index: {}]  }
   0x1   :  { %v32_v0 = vld [vmem:[%s472_s1 + $0x58] sm:$0xff]  ;;  %v31_v1 = vld [vmem:[%s472_s1 + $0x50] sm:$0xff]  ;;  %v30_v2 = vld [vmem:[%s472_s1 + $0x48] sm:$0xff] }
   0x2   :  { %45 = vmatpush.msra.mxu0 %v32_v0  ;;  %295 = vmatpush.msra.mxu2 %v32_v0  ;;  %v29_v3 = vld [vmem:[%s472_s1 + $0x40] sm:$0xff] }
   0x4   :  { %46 = vmatpush.msra.mxu0 %v31_v1  ;;  %296 = vmatpush.msra.mxu2 %v31_v1 }
   0x6   :  { %47 = vmatpush.msra.mxu0 %v30_v2  ;;  %297 = vmatpush.msra.mxu2 %v30_v2 }
   0x7   :  { %9 = vsyncpa [#allocation3], 0  ;;  %v28_v4 = vld [vmem:[%s472_s1 + $0x38] sm:$0xff]  ;;  %v27_v5 = vld [vmem:[%s472_s1 + $0x30] sm:$0xff]  ;;  %vm34_vm0 = vcmask 785408   ;;  %vm64_vm1 = vcmask 64512  }
   0x8   :  { %48 = vmatpush.msra.mxu0 %v29_v3  ;;  %298 = vmatpush.msra.mxu2 %v29_v3  ;;  %v26_v6 = vld [vmem:[%s472_s1 + $0x28] sm:$0xff]  ;;  %v25_v7 = vld [vmem:[%s472_s1 + $0x20] sm:$0xff]  ;;  %v24_v8 = vld [vmem:[%s472_s1 + $0x18] sm:$0xff]  ;;  %v355_v22 = vmov 8.0   ;;  %vm155_vm9 = vcmask 130048   ;;  %s359_s19 = smov 32  }
   0x9   :  { %v23_v9 = vld [vmem:[%s472_s1 + $0x10] sm:$0xff]  ;;  %v22_v10 = vld [vmem:[%s472_s1 + $0x8] sm:$0xff]  ;;  %v21_v11 = vld [vmem:[%s472_s1] sm:$0xff]  ;;  %317 = vrcp.f32 %v355_v22  ;;  %s360_s20 = smov 64   ;;  %s361_s21 = smov 112  }
   0xa   :  { %49 = vmatpush.msra.mxu0 %v28_v4  ;;  %299 = vmatpush.msra.mxu2 %v28_v4  ;;  %v18_v12 = vld [vmem:[%s471_s0] sm:$0xff]  ;;  %v19_v13 = vld [vmem:[%s471_s0 + $0x8] sm:$0xff]  ;;  %s362_s22 = smov 80   ;;  %s363_s23 = smov 96  }
   0xb   :  { %v437_v14 = vld [vmem:[%s474_s3] sm:$0x3f]  ;;  %s358_s3 = smov 48   ;;  %s364_s24 = smov [#allocation2]  }
   0xc   :  { %50 = vmatpush.msra.mxu0 %v27_v5  ;;  %300 = vmatpush.msra.mxu2 %v27_v5  ;;  %v33_v15 = vperm.slane %v437_v14, 0  ;;  %v124_v39 = vld [vmem:[%s473_s2] sm:$0xff]  ;;  %v116_v54 = vperm.slane %v437_v14, 1  ;;  %v119_v58 = vperm.slane %v437_v14, 2  ;;  %s357_s2 = smov 16   ;;  %s280_s25 = sshll.u32 %s364_s24, 4  ;;  %s281_s25 = int_to_ptr.vmem [resolvable:$true] %s280_s25 }
   0xd   :  { %147 = vmatpush.msra.mxu1 %v124_v39  ;;  %s282_s28 = sshll.u32 %s475_s4, 4  ;;  %s283_s28 = int_to_ptr.hbm [resolvable:$true] %s282_s28 }
   0xe   :  { %51 = vmatpush.msra.mxu0 %v26_v6  ;;  %301 = vmatpush.msra.mxu2 %v26_v6  ;;  %v125_v6 = vperm.slane %v437_v14, 3 }
   0xf   :  { %v318_v23 = vpop.eup %317 }
  0x10   :  { %52 = vmatpush.msra.mxu0 %v25_v7  ;;  %302 = vmatpush.msra.mxu2 %v25_v7  ;;  %v72_v24 = vmul.f32 8.0, %v318_v23  ;;  %vm76_vm2 = vweird.f32 %v318_v23 }
  0x12   :  { %53 = vmatpush.msra.mxu0 %v24_v8  ;;  %303 = vmatpush.msra.mxu2 %v24_v8  ;;  %v73_v25 = vsub.f32 1.0, %v72_v24 }
  0x14   :  { %54 = vmatpush.msra.mxu0 %v23_v9  ;;  %304 = vmatpush.msra.mxu2 %v23_v9  ;;  %v74_v26 = vmul.f32 %v318_v23, %v73_v25 }
  0x16   :  { %55 = vmatpush.msra.mxu0 %v22_v10  ;;  %305 = vmatpush.msra.mxu2 %v22_v10  ;;  %v75_v27 = vadd.f32 %v318_v23, %v74_v26 }
  0x18   :  { %56 = vmatpush.msra.mxu0 %v21_v11  ;;  %306 = vmatpush.msra.mxu2 %v21_v11  ;;  %v77_v28 = vsel %vm76_vm2, %v318_v23, %v75_v27  ;;  %vm218_vm2 = vcmask 1041409  }
  0x19   :  { %291 = vmatmul.msk.f32.vlgmr.msra.gmra.mxu0 %vm34_vm0, %v18_v12  ;;  %292 = vmatmul.msk.f32.vlgmr.msra.gmra.mxu2 %vm34_vm0, %v19_v13  ;;  %v356_v13 = vmov 16.0  }
  0x96   :  { %v58_v16 = vpop.f32.mrf.mxu0 }
  0x97   :  { %v59_v17 = vadd.f32 %v58_v16, %v33_v15 }
  0x99   :  { %v65_v18 = vsel %vm64_vm1, %v59_v17, 0.0 }
  0x9a   :  { %66 = vadd.xlane.f32.xlu0 %v65_v18 }
  0x9c   :  { %v61_v19 = vpop.f32.mrf.mxu2 }
  0x9d   :  { %v62_v20 = vadd.f32 %v61_v19, %v33_v15 }
  0x9f   :  { %v68_v21 = vsel %vm64_vm1, %v62_v20, 0.0 }
  0xa2   :  { %69 = vadd.xlane.f32.xlu0 %v68_v21 }
 0x10d   :  { %v67_v29 = vpop.xlane.xlu0 %66 }
 0x10e   :  { %v78_v30 = vmul.f32 %v77_v28, %v67_v29 }
 0x110   :  { %v80_v31 = vsub.f32 %v59_v17, %v78_v30 }
 0x112   :  { %v82_v32 = vmul.f32 %v80_v31, %v80_v31 }
 0x114   :  { %v84_v33 = vsel %vm64_vm1, %v82_v32, 0.0 }
 0x115   :  { %85 = vadd.xlane.f32.xlu1 %v84_v33  ;;  %v70_v34 = vpop.xlane.xlu0 %69 }
 0x116   :  { %v79_v35 = vmul.f32 %v77_v28, %v70_v34 }
 0x118   :  { %v81_v36 = vsub.f32 %v62_v20, %v79_v35 }
 0x11a   :  { %v83_v37 = vmul.f32 %v81_v36, %v81_v36 }
 0x11c   :  { %v87_v38 = vsel %vm64_vm1, %v83_v37, 0.0 }
 0x11d   :  { %88 = vadd.xlane.f32.xlu1 %v87_v38 }
 0x188   :  { %v86_v40 = vpop.xlane.xlu1 %85 }
 0x189   :  { %v90_v41 = vmul.f32 %v86_v40, %v77_v28 }
 0x18b   :  { %v92_v42 = vadd.f32 1e-05, %v90_v41 }
 0x18d   :  { %319 = vrsqrt.f32 %v92_v42  ;;  %vm100_vm4 = vweird.f32 %v92_v42 }
 0x190   :  { %v89_v43 = vpop.xlane.xlu1 %88 }
 0x191   :  { %v91_v44 = vmul.f32 %v89_v43, %v77_v28 }
 0x193   :  { %v320_v45 = vpop.eup %319  ;;  %v93_v46 = vadd.f32 1e-05, %v91_v44 }
 0x194   :  { %v95_v47 = vmul.f32 %v320_v45, %v92_v42  ;;  %vm101_vm3 = vweird.f32 %v320_v45 }
 0x195   :  { %321 = vrsqrt.f32 %v93_v46  ;;  %vm102_vm5 = vmor %vm100_vm4, %vm101_vm3  ;;  %vm110_vm7 = vweird.f32 %v93_v46  ;;  %vm263_vm3 = vcmask 261120   ;;  %vm265_vm4 = vcmask 392192  }
 0x196   :  { %v96_v48 = vmul.f32 %v320_v45, %v95_v47  ;;  %323 = vrcp.f32 %v356_v13 }
 0x198   :  { %v97_v49 = vmul.f32 0.5, %v96_v48 }
 0x19a   :  { %v98_v50 = vsub.f32 1.5, %v97_v49 }
 0x19b   :  { %v322_v51 = vpop.eup %321 }
 0x19c   :  { %v99_v52 = vmul.f32 %v320_v45, %v98_v50  ;;  %v105_v53 = vmul.f32 %v322_v51, %v93_v46  ;;  %vm111_vm6 = vweird.f32 %v322_v51  ;;  %v324_v15 = vpop.eup %323  ;;  %v210_v50 = vperm.slane %v437_v14, 5 }
 0x19d   :  { %vm112_vm8 = vmor %vm110_vm7, %vm111_vm6  ;;  %v163_v16 = vmul.f32 16.0, %v324_v15  ;;  %vm167_vm10 = vweird.f32 %v324_v15  ;;  %vm269_vm6 = vcmask 654336   ;;  %vm272_vm7 = vcmask 916480  }
 0x19e   :  { %v103_v55 = vsel %vm102_vm5, %v320_v45, %v99_v52  ;;  %v106_v56 = vmul.f32 %v322_v51, %v105_v53  ;;  %v207_v45 = vperm.slane %v437_v14, 4  ;;  %vm267_vm5 = vcmask 523264  }
 0x19f   :  { %v114_v57 = vmul.f32 %v103_v55, %v80_v31  ;;  %v164_v17 = vsub.f32 1.0, %v163_v16 }
 0x1a0   :  { %v107_v59 = vmul.f32 0.5, %v106_v56 }
 0x1a1   :  { %v117_v60 = vmul.f32 %v116_v54, %v114_v57  ;;  %v165_v18 = vmul.f32 %v324_v15, %v164_v17 }
 0x1a2   :  { %v108_v61 = vsub.f32 1.5, %v107_v59 }
 0x1a3   :  { %v120_v62 = vadd.f32 %v119_v58, %v117_v60  ;;  %v166_v19 = vadd.f32 %v324_v15, %v165_v18 }
 0x1a4   :  { %v109_v63 = vmul.f32 %v322_v51, %v108_v61 }
 0x1a5   :  { %v122_v0 = vmax.f32 %v120_v62, 0.0  ;;  %v168_v20 = vsel %vm167_vm10, %v324_v15, %v166_v19 }
 0x1a6   :  { %v113_v1 = vsel %vm112_vm8, %v322_v51, %v109_v63 }
 0x1a7   :  { %293 = vmatmul.msk.f32.vlgmr.msra.gmra.mxu1 %vm64_vm1, %v122_v0  ;;  %v115_v2 = vmul.f32 %v113_v1, %v81_v36 }
 0x1a9   :  { %v118_v3 = vmul.f32 %v116_v54, %v115_v2 }
 0x1ab   :  { %v121_v4 = vadd.f32 %v119_v58, %v118_v3 }
 0x1ad   :  { %v123_v5 = vmax.f32 %v121_v4, 0.0 }
 0x1af   :  { %294 = vmatmul.msk.f32.gmra.mxu1 %vm64_vm1, %v123_v5 }
 0x224   :  { %v149_v7 = vpop.f32.mrf.mxu1 }
 0x225   :  { %v150_v8 = vadd.f32 %v149_v7, %v125_v6 }
 0x227   :  { %v156_v9 = vsel %vm155_vm9, %v150_v8, 0.0 }
 0x228   :  { %157 = vadd.xlane.f32.xlu2 %v156_v9 }
 0x22c   :  { %v152_v10 = vpop.f32.mrf.mxu1 }
 0x22d   :  { %v153_v11 = vadd.f32 %v152_v10, %v125_v6 }
 0x22f   :  { %v159_v12 = vsel %vm155_vm9, %v153_v11, 0.0 }
 0x230   :  { %160 = vadd.xlane.f32.xlu2 %v159_v12 }
 0x29b   :  { %v158_v21 = vpop.xlane.xlu2 %157 }
 0x29c   :  { %v169_v22 = vmul.f32 %v168_v20, %v158_v21 }
 0x29e   :  { %v171_v23 = vsub.f32 %v150_v8, %v169_v22 }
 0x2a0   :  { %v173_v24 = vmul.f32 %v171_v23, %v171_v23 }
 0x2a2   :  { %v175_v25 = vsel %vm155_vm9, %v173_v24, 0.0 }
 0x2a3   :  { %176 = vadd.xlane.f32.xlu0 %v175_v25  ;;  %v161_v26 = vpop.xlane.xlu2 %160 }
 0x2a4   :  { %v170_v27 = vmul.f32 %v168_v20, %v161_v26 }
 0x2a6   :  { %v172_v28 = vsub.f32 %v153_v11, %v170_v27 }
 0x2a8   :  { %v174_v29 = vmul.f32 %v172_v28, %v172_v28 }
 0x2aa   :  { %v178_v30 = vsel %vm155_vm9, %v174_v29, 0.0 }
 0x2ab   :  { %179 = vadd.xlane.f32.xlu1 %v178_v30 }
 0x316   :  { %v177_v31 = vpop.xlane.xlu0 %176 }
 0x317   :  { %v181_v32 = vmul.f32 %v177_v31, %v168_v20 }
 0x319   :  { %v183_v33 = vadd.f32 1e-05, %v181_v32 }
 0x31b   :  { %325 = vrsqrt.f32 %v183_v33  ;;  %vm191_vm12 = vweird.f32 %v183_v33 }
 0x31e   :  { %v180_v34 = vpop.xlane.xlu1 %179 }
 0x31f   :  { %v182_v35 = vmul.f32 %v180_v34, %v168_v20 }
 0x321   :  { %v326_v36 = vpop.eup %325  ;;  %v184_v37 = vadd.f32 1e-05, %v182_v35 }
 0x322   :  { %v186_v38 = vmul.f32 %v326_v36, %v183_v33  ;;  %vm192_vm11 = vweird.f32 %v326_v36 }
 0x323   :  { %327 = vrsqrt.f32 %v184_v37  ;;  %vm193_vm13 = vmor %vm191_vm12, %vm192_vm11  ;;  %vm201_vm15 = vweird.f32 %v184_v37 }
 0x324   :  { %v187_v39 = vmul.f32 %v326_v36, %v186_v38 }
 0x326   :  { %v188_v40 = vmul.f32 0.5, %v187_v39 }
 0x328   :  { %v189_v41 = vsub.f32 1.5, %v188_v40 }
 0x329   :  { %v328_v42 = vpop.eup %327 }
 0x32a   :  { %v190_v43 = vmul.f32 %v326_v36, %v189_v41  ;;  %v196_v44 = vmul.f32 %v328_v42, %v184_v37  ;;  %vm202_vm14 = vweird.f32 %v328_v42 }
 0x32b   :  { %vm203_vm1 = vmor %vm201_vm15, %vm202_vm14 }
 0x32c   :  { %v194_v46 = vsel %vm193_vm13, %v326_v36, %v190_v43  ;;  %v197_v47 = vmul.f32 %v328_v42, %v196_v44 }
 0x32d   :  { %v205_v48 = vmul.f32 %v194_v46, %v171_v23 }
 0x32e   :  { %v198_v49 = vmul.f32 0.5, %v197_v47 }
 0x32f   :  { %v208_v51 = vmul.f32 %v207_v45, %v205_v48 }
 0x330   :  { %v199_v52 = vsub.f32 1.5, %v198_v49 }
 0x331   :  { %v211_v54 = vadd.f32 %v210_v50, %v208_v51 }
 0x332   :  { %v200_v53 = vmul.f32 %v328_v42, %v199_v52 }
 0x333   :  { %v213_v57 = vmax.f32 %v211_v54, 0.0 }
 0x334   :  { %v204_v55 = vsel %vm203_vm1, %v328_v42, %v200_v53 }
 0x335   :  { %v206_v56 = vmul.f32 %v204_v55, %v172_v28  ;;  %v221_v61 = vrot.slane %v213_v57, 1  ;;  %v232_v62 = vrot.slane %v213_v57, 3  ;;  %v226_v14 = vrot.slane %v213_v57, 2 }
 0x336   :  { %v238_v7 = vrot.slane %v213_v57, 4  ;;  %v256_v11 = vrot.slane %v213_v57, 7  ;;  %v244_v12 = vrot.slane %v213_v57, 5  ;;  %v250_v17 = vrot.slane %v213_v57, 6 }
 0x337   :  { %v209_v58 = vmul.f32 %v207_v45, %v206_v56 }
 0x339   :  { %v212_v59 = vadd.f32 %v210_v50, %v209_v58 }
 0x33b   :  { %v214_v60 = vmax.f32 %v212_v59, 0.0 }
 0x33d   :  { %v222_v63 = vsel %vm218_vm2, %v214_v60, %v221_v61  ;;  %v233_v0 = vrot.slane %v214_v60, 2  ;;  %v227_v1 = vrot.slane %v214_v60, 1  ;;  %v217_v2 = vrot.slane %v214_v60, 7 }
 0x33e   :  { %223 = vrot.lane.b32.xlu2 %v222_v63, %s357_s2  ;;  %v239_v5 = vrot.slane %v214_v60, 3  ;;  %v257_v8 = vrot.slane %v214_v60, 6  ;;  %v245_v9 = vrot.slane %v214_v60, 4  ;;  %v251_v16 = vrot.slane %v214_v60, 5 }
 0x33f   :  { %v234_v3 = vsel %vm218_vm2, %v233_v0, %v232_v62  ;;  %v228_v4 = vsel %vm218_vm2, %v227_v1, %v226_v14  ;;  %v219_v6 = vsel %vm218_vm2, %v217_v2, %v213_v57 }
 0x340   :  { %235 = vrot.lane.b32.xlu1 %v234_v3, %s358_s3  ;;  %229 = vrot.lane.b32.xlu0 %v228_v4, %s359_s19  ;;  %v240_v10 = vsel %vm218_vm2, %v239_v5, %v238_v7  ;;  %v258_v13 = vsel %vm218_vm2, %v257_v8, %v256_v11  ;;  %v246_v15 = vsel %vm218_vm2, %v245_v9, %v244_v12 }
 0x341   :  { %v252_v18 = vsel %vm218_vm2, %v251_v16, %v250_v17 }
 0x346   :  { %241 = vrot.lane.b32.xlu2 %v240_v10, %s360_s20 }
 0x348   :  { %259 = vrot.lane.b32.xlu1 %v258_v13, %s361_s21  ;;  %247 = vrot.lane.b32.xlu0 %v246_v15, %s362_s22 }
 0x34e   :  { %253 = vrot.lane.b32.xlu2 %v252_v18, %s363_s23 }
 0x398   :  { %v224_v19 = vpop.permute.xlu2 %223 }
 0x399   :  { %v262_v23 = vsel %vm155_vm9, %v219_v6, %v224_v19 }
 0x3a0   :  { %v242_v20 = vpop.permute.xlu2 %241 }
 0x3a8   :  { %v254_v28 = vpop.permute.xlu2 %253 }
 0x3b2   :  { %v236_v21 = vpop.permute.xlu1 %235  ;;  %v230_v22 = vpop.permute.xlu0 %229 }
 0x3b3   :  { %v264_v24 = vsel %vm263_vm3, %v262_v23, %v230_v22 }
 0x3b4   :  { %v266_v25 = vsel %vm265_vm4, %v264_v24, %v236_v21 }
 0x3b5   :  { %v268_v27 = vsel %vm267_vm5, %v266_v25, %v242_v20 }
 0x3ba   :  { %v248_v26 = vpop.permute.xlu0 %247  ;;  %v260_v30 = vpop.permute.xlu1 %259 }
 0x3bb   :  { %v270_v29 = vsel %vm269_vm6, %v268_v27, %v248_v26 }
 0x3bc   :  { %v271_v31 = vsel %vm34_vm0, %v270_v29, %v254_v28 }
 0x3bd   :  { %v273_v32 = vsel %vm272_vm7, %v271_v31, %v260_v30 }
 0x3be   :  { %274 = vst [vmem:[#allocation2] sm:$0x3] %v273_v32 }
 0x3bf   :  { %285 = dma.vmem_to_hbm [thread:$0]  %s281_s25, 32, %s283_s28, [#allocation3]  }
 0x3c0   :  { %353 = dma.done.wait [#allocation3], 32  }
 0x3c1   :  { %354 = vsyncadd [#allocation3], 4294967264 }
 0x3c2   :  { %290 = vsyncpa [#allocation3], 1 }

</bundles_post_ra>
